<compile_context>
chip_gen: v7x
topology: tpu7x:2x2x1
jax: 0.10.0
libtpu: 0.0.40
codegen_flags: <defaults>
</compile_context>

<pallas_src>
import math

import jax
import jax.numpy as jnp
from jax.experimental import pallas as pl
from jax.experimental.pallas import tpu as pltpu


# ------------------------------- kernel --------------------------------------

def _vpt_select_kernel(lidx_ref, p_ref, out_ref):
    # lidx_ref (SMEM scalar-prefetch) is consumed by the index_map only.
    del lidx_ref
    out_ref[...] = p_ref[...]


def _build_select_call(p_len, embed_dim, dtype):
    grid_spec = pltpu.PrefetchScalarGridSpec(
        num_scalar_prefetch=1,
        grid=(1,),
        in_specs=[
            # Data-dependent layer selection: only the chosen (L, E) prompt is
            # DMA'd from the stacked (NUM_LAYERS, L, E) parameter slab.
            pl.BlockSpec((None, p_len, embed_dim),
                         lambda i, lidx: (lidx[0], 0, 0)),
        ],
        out_specs=pl.BlockSpec((p_len, embed_dim), lambda i, lidx: (0, 0)),
    )
    return pl.pallas_call(
        _vpt_select_kernel,
        out_shape=jax.ShapeDtypeStruct((p_len, embed_dim), dtype),
        grid_spec=grid_spec,
        compiler_params=pltpu.CompilerParams(
            dimension_semantics=("arbitrary",)),
    )


# ------------------------------ module wrapper --------------------------------

def make_vpt_params(key, prompt_param, embed_dim, prompt_deep=True):
    """Replicates VPT.__init__: one (e_p_length, embed_dim) prompt per layer,
    init uniform(-val, val) with val = sqrt(6 / (3*196 + embed_dim))."""
    _e_pool_size, e_p_length = prompt_param      # pool size is unused in forward
    e_layers = [-1] + (list(range(12)) if prompt_deep else [])
    val = math.sqrt(6.0 / float(3 * 196 + embed_dim))
    keys = jax.random.split(key, len(e_layers))
    prompts = jnp.stack([
        jax.random.uniform(k, (e_p_length, embed_dim), jnp.float32,
                           minval=-val, maxval=val)
        for k in keys
    ])                                            # (NUM_LAYERS, L, E)
    return prompts, e_layers


def vpt_forward(x_query, l, prompts, e_layers):
    """VPT.forward(x_query, l) -> (prompt or None, loss)."""
    del x_query  # faithful to the PyTorch module: forward does not use the query
    loss = jnp.float32(0.0)
    if l not in e_layers:                         # static check, same as PyTorch
        return None, loss
    _num_layers, p_len, embed_dim = prompts.shape
    slot = jnp.array([e_layers.index(l)], dtype=jnp.int32)
    call = _build_select_call(p_len, embed_dim, prompts.dtype)
    p_return = call(slot, prompts)
    return p_return, loss


# ------------------------------ pure-JAX ref ----------------------------------

def ref_forward(l, prompts, e_layers):
    if l not in e_layers:
        return None, 0.0
    return prompts[e_layers.index(l)], 0.0


# ----------------------------------- demo -------------------------------------

if __name__ == "__main__":
    # small shapes: pool=8, prompt length=8, embed_dim=32, key_dim=32, batch=2
    E_POOL, P_LEN, EMBED, KEY_D, B = 8, 8, 32, 32, 2

    root = jax.random.PRNGKey(0)
    k_param, k_x = jax.random.split(root)
    prompts, e_layers = make_vpt_params(k_param, (E_POOL, P_LEN), EMBED,
                                        prompt_deep=True)
    x_query = jax.random.normal(k_x, (B, KEY_D), dtype=jnp.float32)

    # valid layers: shallow prompt (-1) and a few deep layers
    for layer in (-1, 0, 5, 11):
        p_ret, loss = vpt_forward(x_query, layer, prompts, e_layers)
        p_ret = jax.block_until_ready(p_ret)
        expected, _ = ref_forward(layer, prompts, e_layers)
        assert p_ret.shape == (P_LEN, EMBED)
        assert jnp.array_equal(p_ret, expected), f"mismatch for layer {layer}"
        assert float(loss) == 0.0

    # invalid layer -> (None, 0), matching the PyTorch fallthrough
    p_ret, loss = vpt_forward(x_query, 99, prompts, e_layers)
    assert p_ret is None and float(loss) == 0.0

    print("KERNEL_OK")
</pallas_src>

<mosaic_0001>
module attributes {stable_mosaic.version = 11 : i64} {
  func.func @_vpt_select_kernel(%arg0: i32, %arg1: memref<1xi32, #tpu.memory_space<smem>>, %arg2: memref<1x8x32xf32, #tpu.memory_space<vmem>>, %arg3: memref<8x32xf32, #tpu.memory_space<vmem>>) attributes {dimension_semantics = [#tpu.dimension_semantics<arbitrary>], iteration_bounds = array<i64: 1>, scalar_prefetch = 1 : i64, scratch_operands = 0 : i64, tpu.core_type = #tpu.core_type<tc>, window_params = [{transform_indices = @transform_0, window_bounds = array<i64: 1, 8, 32>}, {pipeline_mode = #tpu.pipeline_mode<synchronous>, transform_indices = @transform_1, window_bounds = array<i64: 8, 32>}]} {
    %c0 = arith.constant 0 : index
    %c0_0 = arith.constant 0 : index
    %c0_1 = arith.constant 0 : index
    %0 = vector.load %arg2[%c0, %c0_0, %c0_1] : memref<1x8x32xf32, #tpu.memory_space<vmem>>, vector<1x8x32xf32>
    %1 = vector.shape_cast %0 : vector<1x8x32xf32> to vector<8x32xf32>
    %c0_2 = arith.constant 0 : index
    %c0_3 = arith.constant 0 : index
    %2 = vector.load %arg3[%c0_2, %c0_3] : memref<8x32xf32, #tpu.memory_space<vmem>>, vector<8x32xf32>
    tpu.vector_store %arg3[%c0_2, %c0_3], %1 {strides = array<i32>} : memref<8x32xf32, #tpu.memory_space<vmem>>, vector<8x32xf32>,
    return
  }
  func.func @transform_0(%arg0: i32, %arg1: memref<1xi32, #tpu.memory_space<smem>>) -> (i32, i32, i32) {
    %c0 = arith.constant 0 : index
    %0 = memref.load %arg1[%c0] : memref<1xi32, #tpu.memory_space<smem>>
    %c0_i32 = arith.constant 0 : i32
    %c0_i32_0 = arith.constant 0 : i32
    %c0_i32_1 = arith.constant 0 : i32
    return %0, %c0_i32, %c0_i32_0 : i32, i32, i32
  }
  func.func @transform_1(%arg0: i32, %arg1: memref<1xi32, #tpu.memory_space<smem>>) -> (i32, i32) {
    %c0_i32 = arith.constant 0 : i32
    %c0_i32_0 = arith.constant 0 : i32
    %c0_i32_1 = arith.constant 0 : i32
    return %c0_i32, %c0_i32_0 : i32, i32
  }
}

</mosaic_0001>

<bundles_post_ra>
// kernel: tpu_custom_call.1
= control target key start
LH: loop header
LB: loop body
LE: loop exit
PB: predicated region body
PF: predicated region fallthrough
CT: control target
= control target key end

     0   :  { %8 = vsyncpa [#allocation5], 0  ;;  %s141_s0 = inlined_call_operand.<no memory space> [shape: s32[1], index: 0, kind: input, shape index: {}]   ;;  %s142_s1 = inlined_call_operand.hbm [shape: f32[13,8,32], index: 1, kind: input, shape index: {}]   ;;  %s143_s2 = inlined_call_operand.hbm [shape: f32[8,32], index: 2, kind: output, shape index: {}]  }
   0x1   :  { %9 = vsyncpa [#allocation6], 0  ;;  %s47_s11 = sshll.u32 %s141_s0, 7  ;;  %s100_s15 = smov [#allocation4]  }
   0x2   :  { %s17_s14 = scalar_lea.hbm %s142_s1, %s47_s11  ;;  %s19_s16 = sshll.u32 %s100_s15, 4  ;;  %s20_s16 = int_to_ptr.vmem [resolvable:$true] %s19_s16 }
   0x3   :  { %s50_s17 = scalar_lea.hbm %s17_s14, 128  ;;  %s52_s20 = scalar_lea.hbm %s142_s1, 1664 }
   0x4   :  { %p51_p0 = scmp.ne.s32.totalorder %s17_s14, %s50_s17  ;;  %p53_p1 = scmp.lt.u32.totalorder %s17_s14, %s142_s1 }
   0x5   :  { %p54_p2 = scmp.lt.u32.totalorder %s52_s20, %s50_s17  ;;  %p56_p4 = scmp.lt.u32.totalorder %s50_s17, %s17_s14 }
   0x7   :  { %p55_p3 = por %p54_p2, %p53_p1 }
   0x9   :  { %p57_p5 = por %p56_p4, %p55_p3 }
   0xb   :  { %p58_p6 = pnand %p57_p5, %p51_p0 }
   0xd   :  { %61 = shalt.err (!%p58_p6)
}
   0xe   :  { %s62_s0 = scalar_lea.vmem %s20_s16, 128  ;;  %p67_p8 = scmp.lt.s32.totalorder %s20_s16, %s20_s16 }
   0xf   :  { %p63_p7 = scmp.ne.s32.totalorder %s20_s16, %s62_s0  ;;  %p68_p9 = scmp.lt.s32.totalorder %s62_s0, %s62_s0 }
  0x11   :  { %p69_p10 = por %p68_p9, %p67_p8 }
  0x13   :  { %p70_p11 = pnand %p69_p10, %p63_p7 }
  0x15   :  { %73 = shalt.err (!%p70_p11)
}
  0x16   :  { %22 = dma.hbm_to_vmem [thread:$0]  %s17_s14, 128, %s20_s16, [#allocation5]  }
  0x17   :  { %96 = dma.done.wait [#allocation5], 128  }
  0x18   :  { %97 = vsyncadd [#allocation5], 4294967168  ;;  %s101_s23 = smov [#allocation7]   ;;  %vm28_vm0 = vcmask 261120   ;;  %v27_v0 = vld [vmem:[#allocation4] sm:$0xff] }
  0x19   :  { %s36_s24 = sshll.u32 %s101_s23, 4  ;;  %29 = vst.msk [vmem:[#allocation7] sm:$0xff] %vm28_vm0, %v27_v0  ;;  %s37_s24 = int_to_ptr.vmem [resolvable:$true] %s36_s24 }
  0x1a   :  { %s74_s1 = scalar_lea.vmem %s37_s24, 128  ;;  %p79_p13 = scmp.lt.s32.totalorder %s37_s24, %s37_s24 }
  0x1b   :  { %p75_p12 = scmp.ne.s32.totalorder %s37_s24, %s74_s1  ;;  %p80_p0 = scmp.lt.s32.totalorder %s74_s1, %s74_s1 }
  0x1d   :  { %p81_p1 = por %p80_p0, %p79_p13 }
  0x1f   :  { %p82_p2 = pnand %p81_p1, %p75_p12 }
  0x21   :  { %85 = shalt.err (!%p82_p2)
}
  0x22   :  { %s86_s27 = scalar_lea.hbm %s143_s2, 128 }
  0x23   :  { %p87_p3 = scmp.ne.s32.totalorder %s143_s2, %s86_s27  ;;  %p90_p4 = scmp.lt.u32.totalorder %s86_s27, %s143_s2 }
  0x25   :  { %p92_p5 = pnand %p90_p4, %p87_p3 }
  0x27   :  { %95 = shalt.err (!%p92_p5)
}
  0x28   :  { %39 = dma.vmem_to_hbm [thread:$0]  %s37_s24, 128, %s143_s2, [#allocation6]  }
  0x29   :  { %98 = dma.done.wait [#allocation6], 128  }
  0x2a   :  { %99 = vsyncadd [#allocation6], 4294967168 }
  0x2b   :  { %43 = vsyncpa [#allocation5], 1 }
  0x2c   :  { %44 = vsyncpa [#allocation6], 1 }

</bundles_post_ra>
